<compile_context>
chip_gen: v6e
topology: v6e:2x2x1
jax: 0.10.0
libtpu: 0.0.40
codegen_flags: <defaults>
</compile_context>

<pallas_src>
import functools

import jax
import jax.numpy as jnp
from jax import lax
from jax.experimental import pallas as pl
from jax.experimental.pallas import tpu as pltpu

EPS = 1e-5

# Tile-sized f32 VMEM buffers counted per lane column when sizing the feature
# tile:  x input (double-buffered) -> 2, output (double-buffered) -> 2,
# compiler temporaries for (x - mean) / centered square -> ~2.
_NUM_TILE_BUFFERS = 6


def _vmem_capacity_bytes():
    """Physical VMEM of the current generation; conservative fallback."""
    try:
        return int(pltpu.get_tpu_info().vmem_capacity_bytes)
    except Exception:
        return 64 << 20  # v7x has the smallest VMEM -> safe everywhere


def _clamp_vmem_limit(needed_bytes, vmem_capacity):
    cap = int(vmem_capacity * 3 // 4)  # stay well under physical VMEM
    return int(min(max(needed_bytes + (2 << 20), 32 << 20), cap))


# ----------------------------------------------------------------------------
# Single-pass kernel: full batch resident per feature slab.
# ----------------------------------------------------------------------------
def _bn_scale_kernel(x_ref, scale_ref, o_ref, *, eps):
    # x_ref: (N, TC)   scale_ref: (1, TC)   o_ref: (N, TC)
    x = x_ref[...].astype(jnp.float32)
    inv_n = jnp.float32(1.0 / x.shape[0])          # static, no runtime divide
    mean = jnp.sum(x, axis=0, keepdims=True) * inv_n
    xc = x - mean
    # Centered variance over the VMEM-resident tile (free: kernel is HBM-bound).
    var = jnp.sum(xc * xc, axis=0, keepdims=True) * inv_n
    # Fold the per-feature scale into inv_std on the (1, TC) vector so the
    # full-tile work is just one sub + one mul per element.
    s = scale_ref[...].astype(jnp.float32) * lax.rsqrt(var + eps)
    o_ref[...] = (xc * s).astype(o_ref.dtype)


# ----------------------------------------------------------------------------
# Two-pass kernels for large N (batch tiled, stats accumulated in VMEM scratch).
# ----------------------------------------------------------------------------
def _bn_stats_kernel(x_ref, scale_ref, mean_ref, s_ref, s1_ref, s2_ref, *,
                     n_total, eps):
    # grid = (feature_blocks, batch_blocks); reduction (batch) axis is last.
    t = pl.program_id(1)

    @pl.when(t == 0)
    def _():
        s1_ref[...] = jnp.zeros_like(s1_ref)
        s2_ref[...] = jnp.zeros_like(s2_ref)

    x = x_ref[...].astype(jnp.float32)
    tn = x.shape[0]
    if n_total % tn != 0:
        # Mask padded rows of the ragged last batch tile out of the reduction.
        row = lax.broadcasted_iota(jnp.int32, x.shape, 0) + t * tn
        x = jnp.where(row < n_total, x, 0.0)
    s1_ref[...] += jnp.sum(x, axis=0, keepdims=True)
    s2_ref[...] += jnp.sum(x * x, axis=0, keepdims=True)

    @pl.when(t == pl.num_programs(1) - 1)
    def _():
        inv_n = jnp.float32(1.0 / n_total)
        mean = s1_ref[...] * inv_n
        # Clamp guards the E[x^2]-mean^2 formulation against tiny negatives.
        var = jnp.maximum(s2_ref[...] * inv_n - mean * mean, 0.0)
        mean_ref[...] = mean
        s_ref[...] = scale_ref[...].astype(jnp.float32) * lax.rsqrt(var + eps)


def _bn_norm_kernel(x_ref, mean_ref, s_ref, o_ref):
    x = x_ref[...].astype(jnp.float32)
    o_ref[...] = ((x - mean_ref[...]) * s_ref[...]).astype(o_ref.dtype)


# ----------------------------------------------------------------------------
# Tile picking / wrappers
# ----------------------------------------------------------------------------
def _pick_feature_tile(N, C, budget_bytes):
    """Widest lane-dense feature tile whose full-batch block footprint fits the
    budget.  Returns None if even a 128-wide full-batch block does not fit
    (-> use the batch-tiled two-pass path)."""
    per_lane = _NUM_TILE_BUFFERS * N * 4
    max_lanes = (budget_bytes // max(per_lane, 1)) // 128 * 128
    if max_lanes < 128:
        return None
    c_pad = pl.cdiv(C, 128) * 128
    if max_lanes >= c_pad:
        # Whole feature axis fits in one block.  Split into two wide blocks
        # (one grid step per v7x TensorCore on the "parallel" axis) only if
        # both halves stay >= 512 lanes; otherwise one maximal block wins.
        if c_pad >= 1024:
            return int(pl.cdiv(c_pad // 2, 128) * 128)
        return C
    return int(max_lanes)


def _bn_single_pass(x, scale2d, feature_tile, eps, vmem_capacity):
    N, C = x.shape
    grid = (pl.cdiv(C, feature_tile),)
    needed = _NUM_TILE_BUFFERS * N * feature_tile * 4 + 8 * feature_tile * 4
    return pl.pallas_call(
        functools.partial(_bn_scale_kernel, eps=eps),
        out_shape=jax.ShapeDtypeStruct((N, C), x.dtype),
        grid_spec=pltpu.PrefetchScalarGridSpec(
            num_scalar_prefetch=0,
            grid=grid,
            in_specs=[
                pl.BlockSpec((N, feature_tile), lambda j: (0, j)),
                pl.BlockSpec((1, feature_tile), lambda j: (0, j)),
            ],
            out_specs=pl.BlockSpec((N, feature_tile), lambda j: (0, j)),
        ),
        compiler_params=pltpu.CompilerParams(
            dimension_semantics=("parallel",),
            vmem_limit_bytes=_clamp_vmem_limit(needed, vmem_capacity),
        ),
    )(x, scale2d)


def _bn_two_pass(x, scale2d, eps, vmem_capacity, budget_bytes,
                 batch_tile=None, feature_tile=None):
    N, C = x.shape
    c_pad = pl.cdiv(C, 128) * 128
    if feature_tile is None:
        feature_tile = C if c_pad <= 2048 else 2048      # lane-dense slab
    if batch_tile is None:
        batch_tile = (budget_bytes // max(_NUM_TILE_BUFFERS * feature_tile * 4, 1)) // 8 * 8
        batch_tile = max(8, batch_tile)
        if batch_tile >= N:
            batch_tile = N
    tn, tc = batch_tile, feature_tile
    n_steps = pl.cdiv(N, tn)
    c_steps = pl.cdiv(C, tc)

    # Pass 1: per-feature sum / sum-of-squares over batch tiles, finalized into
    # mean and (scale * inv_std) vectors on the last batch step.
    stats_needed = 4 * tn * tc * 4 + 16 * tc * 4
    mean, s = pl.pallas_call(
        functools.partial(_bn_stats_kernel, n_total=N, eps=eps),
        out_shape=(jax.ShapeDtypeStruct((1, C), jnp.float32),
                   jax.ShapeDtypeStruct((1, C), jnp.float32)),
        grid_spec=pltpu.PrefetchScalarGridSpec(
            num_scalar_prefetch=0,
            grid=(c_steps, n_steps),
            in_specs=[
                pl.BlockSpec((tn, tc), lambda c, t: (t, c)),
                pl.BlockSpec((1, tc), lambda c, t: (0, c)),
            ],
            out_specs=[
                pl.BlockSpec((1, tc), lambda c, t: (0, c)),
                pl.BlockSpec((1, tc), lambda c, t: (0, c)),
            ],
            scratch_shapes=[pltpu.VMEM((1, tc), jnp.float32),
                            pltpu.VMEM((1, tc), jnp.float32)],
        ),
        compiler_params=pltpu.CompilerParams(
            dimension_semantics=("parallel", "arbitrary"),
            vmem_limit_bytes=_clamp_vmem_limit(stats_needed, vmem_capacity),
        ),
    )(x, scale2d)

    # Pass 2: stream x again and normalize with the per-feature vectors.
    norm_needed = _NUM_TILE_BUFFERS * tn * tc * 4 + 16 * tc * 4
    return pl.pallas_call(
        _bn_norm_kernel,
        out_shape=jax.ShapeDtypeStruct((N, C), x.dtype),
        grid_spec=pltpu.PrefetchScalarGridSpec(
            num_scalar_prefetch=0,
            grid=(n_steps, c_steps),
            in_specs=[
                pl.BlockSpec((tn, tc), lambda t, c: (t, c)),
                pl.BlockSpec((1, tc), lambda t, c: (0, c)),
                pl.BlockSpec((1, tc), lambda t, c: (0, c)),
            ],
            out_specs=pl.BlockSpec((tn, tc), lambda t, c: (t, c)),
        ),
        compiler_params=pltpu.CompilerParams(
            dimension_semantics=("parallel", "parallel"),
            vmem_limit_bytes=_clamp_vmem_limit(norm_needed, vmem_capacity),
        ),
    )(x, mean, s)


def batch_norm_with_scale(x, scale, *, eps=EPS, feature_tile=None,
                          batch_tile=None, force_two_pass=False):
    """y = scale * BatchNorm1d(x)  (training mode, affine=False, biased var).

    x: (N, C), scale: (C,).
    """
    N, C = x.shape
    scale2d = scale.reshape(1, C)
    vmem_capacity = _vmem_capacity_bytes()
    budget = int(vmem_capacity * 6 // 10)   # generation-aware block budget

    if not force_two_pass:
        ft = feature_tile if feature_tile is not None else _pick_feature_tile(N, C, budget)
        if ft is not None:
            return _bn_single_pass(x, scale2d, ft, eps, vmem_capacity)
    return _bn_two_pass(x, scale2d, eps, vmem_capacity, budget,
                        batch_tile=batch_tile, feature_tile=feature_tile)


if __name__ == "__main__":
    # nn.BatchNorm1d(num_features=256, affine=False) with a learnable scale;
    # batch = 8 (training-mode forward).
    N, C = 8, 256
    key = jax.random.PRNGKey(0)
    x = jax.random.normal(key, (N, C), dtype=jnp.float32) * 2.0 + 0.5
    scale = jnp.ones((C,), dtype=jnp.float32)   # nn.Parameter(torch.ones(...))

    def ref_fn(xr, sc):
        mean = jnp.mean(xr, axis=0, keepdims=True)
        var = jnp.mean((xr - mean) ** 2, axis=0, keepdims=True)
        return sc.reshape(1, -1) * (xr - mean) / jnp.sqrt(var + EPS)

    out = jax.block_until_ready(batch_norm_with_scale(x, scale))
    assert jnp.allclose(out, ref_fn(x, scale), atol=1e-5, rtol=1e-5), \
        "single-pass mismatch vs reference"

    # Also exercise the batch-tiled two-pass (large-N) path at a small shape,
    # including a ragged batch grid (20 rows with batch tile 8).
    N2 = 20
    x2 = jax.random.normal(jax.random.PRNGKey(0), (N2, C), dtype=jnp.float32) * 1.5 - 0.25
    out2 = jax.block_until_ready(
        batch_norm_with_scale(x2, scale, force_two_pass=True,
                              batch_tile=8, feature_tile=128))
    assert jnp.allclose(out2, ref_fn(x2, scale), atol=1e-4, rtol=1e-4), \
        "two-pass mismatch vs reference"

    print("KERNEL_OK")
</pallas_src>

<mosaic_0001>
module attributes {stable_mosaic.version = 11 : i64} {
  func.func @_bn_scale_kernel(%arg0: i32, %arg1: memref<8x256xf32, #tpu.memory_space<vmem>>, %arg2: memref<1x256xf32, #tpu.memory_space<vmem>>, %arg3: memref<8x256xf32, #tpu.memory_space<vmem>>) attributes {dimension_semantics = [#tpu.dimension_semantics<parallel>], iteration_bounds = array<i64: 1>, scalar_prefetch = 0 : i64, scratch_operands = 0 : i64, tpu.core_type = #tpu.core_type<tc>, window_params = [{transform_indices = @transform_0, window_bounds = array<i64: 8, 256>}, {transform_indices = @transform_1, window_bounds = array<i64: 1, 256>}, {transform_indices = @transform_2, window_bounds = array<i64: 8, 256>}]} {
    %c0 = arith.constant 0 : index
    %c0_0 = arith.constant 0 : index
    %0 = vector.load %arg1[%c0, %c0_0] : memref<8x256xf32, #tpu.memory_space<vmem>>, vector<8x256xf32>
    %cst = arith.constant dense<0.000000e+00> : vector<256xf32>
    %1 = vector.multi_reduction <add>, %0, %cst [0] : vector<8x256xf32> to vector<256xf32>
    %2 = vector.shape_cast %1 : vector<256xf32> to vector<1x256xf32>
    %cst_1 = arith.constant 1.250000e-01 : f32
    %3 = vector.broadcast %cst_1 : f32 to vector<1x256xf32>
    %4 = arith.mulf %2, %3 : vector<1x256xf32>
    %5 = vector.broadcast %4 : vector<1x256xf32> to vector<8x256xf32>
    %6 = arith.subf %0, %5 : vector<8x256xf32>
    %7 = arith.mulf %6, %6 : vector<8x256xf32>
    %cst_2 = arith.constant dense<0.000000e+00> : vector<256xf32>
    %8 = vector.multi_reduction <add>, %7, %cst_2 [0] : vector<8x256xf32> to vector<256xf32>
    %9 = vector.shape_cast %8 : vector<256xf32> to vector<1x256xf32>
    %cst_3 = arith.constant 1.250000e-01 : f32
    %10 = vector.broadcast %cst_3 : f32 to vector<1x256xf32>
    %11 = arith.mulf %9, %10 : vector<1x256xf32>
    %c0_4 = arith.constant 0 : index
    %c0_5 = arith.constant 0 : index
    %12 = vector.load %arg2[%c0_4, %c0_5] : memref<1x256xf32, #tpu.memory_space<vmem>>, vector<1x256xf32>
    %cst_6 = arith.constant 9.99999974E-6 : f32
    %13 = vector.broadcast %cst_6 : f32 to vector<1x256xf32>
    %14 = arith.addf %11, %13 : vector<1x256xf32>
    %15 = math.rsqrt %14 : vector<1x256xf32>
    %16 = arith.mulf %12, %15 : vector<1x256xf32>
    %17 = vector.broadcast %16 : vector<1x256xf32> to vector<8x256xf32>
    %18 = arith.mulf %6, %17 : vector<8x256xf32>
    %c0_7 = arith.constant 0 : index
    %c0_8 = arith.constant 0 : index
    %19 = vector.load %arg3[%c0_7, %c0_8] : memref<8x256xf32, #tpu.memory_space<vmem>>, vector<8x256xf32>
    tpu.vector_store %arg3[%c0_7, %c0_8], %18 {strides = array<i32>} : memref<8x256xf32, #tpu.memory_space<vmem>>, vector<8x256xf32>,
    return
  }
  func.func @transform_0(%arg0: i32) -> (i32, i32) {
    %c0_i32 = arith.constant 0 : i32
    %c0_i32_0 = arith.constant 0 : i32
    return %c0_i32, %arg0 : i32, i32
  }
  func.func @transform_1(%arg0: i32) -> (i32, i32) {
    %c0_i32 = arith.constant 0 : i32
    %c0_i32_0 = arith.constant 0 : i32
    return %c0_i32, %arg0 : i32, i32
  }
  func.func @transform_2(%arg0: i32) -> (i32, i32) {
    %c0_i32 = arith.constant 0 : i32
    %c0_i32_0 = arith.constant 0 : i32
    return %c0_i32, %arg0 : i32, i32
  }
}

</mosaic_0001>

<bundles_post_ra>
// kernel: tpu_custom_call.1
= control target key start
LH: loop header
LB: loop body
LE: loop exit
PB: predicated region body
PF: predicated region fallthrough
CT: control target
= control target key end

     0   :  { %7 = vsyncpa [#allocation3], 0  ;;  %s227_s0 = inlined_call_operand.hbm [shape: f32[8,256], index: 0, kind: input, shape index: {}]   ;;  %s228_s1 = inlined_call_operand.hbm [shape: f32[1,256], index: 1, kind: input, shape index: {}]   ;;  %s229_s2 = inlined_call_operand.hbm [shape: f32[8,256], index: 2, kind: output, shape index: {}]  }
   0x1   :  { %8 = vsyncpa [#allocation6], 0 }
   0x2   :  { %9 = vsyncpa [#allocation4], 0  ;;  %s199_s9 = smov [#allocation2]   ;;  %s200_s11 = smov [#allocation5]  }
   0x3   :  { %s16_s10 = sshll.u32 %s199_s9, 4  ;;  %s26_s12 = sshll.u32 %s200_s11, 4  ;;  %s17_s10 = int_to_ptr.vmem [resolvable:$true] %s16_s10  ;;  %s27_s12 = int_to_ptr.vmem [resolvable:$true] %s26_s12 }
   0x4   :  { %s141_s13 = scalar_lea.vmem %s17_s10, 256  ;;  %p146_p1 = scmp.lt.s32.totalorder %s17_s10, %s17_s10 }
   0x5   :  { %p142_p0 = scmp.ne.s32.totalorder %s17_s10, %s141_s13  ;;  %p147_p2 = scmp.lt.s32.totalorder %s141_s13, %s141_s13 }
   0x7   :  { %p148_p3 = por %p147_p2, %p146_p1 }
   0x9   :  { %p149_p4 = pnand %p148_p3, %p142_p0 }
   0xb   :  { %152 = shalt.err (!%p149_p4)
}
   0xc   :  { %19 = dma.hbm_to_vmem [thread:$0]  %s227_s0, 256, %s17_s10, [#allocation3]  }
   0xd   :  { %s161_s16 = scalar_lea.vmem %s27_s12, 32  ;;  %p166_p6 = scmp.lt.s32.totalorder %s27_s12, %s27_s12 }
   0xe   :  { %p162_p5 = scmp.ne.s32.totalorder %s27_s12, %s161_s16  ;;  %p167_p7 = scmp.lt.s32.totalorder %s161_s16, %s161_s16 }
  0x10   :  { %p168_p8 = por %p167_p7, %p166_p6 }
  0x12   :  { %p169_p9 = pnand %p168_p8, %p162_p5 }
  0x14   :  { %172 = shalt.err (!%p169_p9)
}
  0x15   :  { %29 = dma.hbm_to_vmem [thread:$0]  %s228_s1, 32, %s27_s12, [#allocation6]  }
  0x16   :  { %193 = dma.done.wait [#allocation3], 256  }
  0x17   :  { %194 = vsyncadd [#allocation3], 4294967040 }
  0x18   :  { %195 = dma.done.wait [#allocation6], 32  }
  0x19   :  { %196 = vsyncadd [#allocation6], 4294967264  ;;  %v36_v0 = vld [vmem:[#allocation2] sm:$0xff]  ;;  %v37_v1 = vld [vmem:[#allocation2 + $0x8] sm:$0xff]  ;;  %v201_v36 = vmov 1966171168   ;;  %v81_v38 = vlaneseq }
  0x1a   :  { %v38_v2 = vrot.slane %v36_v0, 4  ;;  %v44_v3 = vrot.slane %v37_v1, 4  ;;  %v79_v37 = vunpack.c.l.s4 %v201_v36  ;;  %v70_v46 = vld [vmem:[#allocation5] sm:$0x3]  ;;  %s202_s0 = smov [#allocation7]  }
  0x1b   :  { %v82_v40 = vshrl.u32 %v81_v38, 7  ;;  %s115_s1 = sshll.u32 %s202_s0, 4  ;;  %s116_s1 = int_to_ptr.vmem [resolvable:$true] %s115_s1 }
  0x1c   :  { %v39_v4 = vadd.f32 %v38_v2, %v36_v0  ;;  %v45_v5 = vadd.f32 %v44_v3, %v37_v1  ;;  %v80_v39 = vunpack.c.0.s8 %v79_v37  ;;  %s173_s19 = scalar_lea.vmem %s116_s1, 256  ;;  %p178_p11 = scmp.lt.s32.totalorder %s116_s1, %s116_s1 }
  0x1d   :  { %v97_v48 = vsub.s32 0, %v82_v40  ;;  %v101_v49 = vsub.s32 1, %v82_v40  ;;  %p174_p10 = scmp.ne.s32.totalorder %s116_s1, %s173_s19  ;;  %p179_p12 = scmp.lt.s32.totalorder %s173_s19, %s173_s19 }
  0x1e   :  { %v40_v6 = vrot.slane %v39_v4, 2  ;;  %v46_v7 = vrot.slane %v45_v5, 2  ;;  %v83_v42 = vsub.s32 %v80_v39, %v82_v40 }
  0x1f   :  { %p180_p13 = por %p179_p12, %p178_p11 }
  0x20   :  { %v41_v8 = vadd.f32 %v40_v6, %v39_v4  ;;  %v47_v9 = vadd.f32 %v46_v7, %v45_v5 }
  0x21   :  { %p181_p0 = pnand %p180_p13, %p174_p10 }
  0x22   :  { %v42_v10 = vrot.slane %v41_v8, 1  ;;  %v48_v11 = vrot.slane %v47_v9, 1 }
  0x24   :  { %v43_v12 = vadd.f32 %v42_v10, %v41_v8  ;;  %v49_v13 = vadd.f32 %v48_v11, %v47_v9 }
  0x26   :  { %v50_v14 = vmul.f32 0.125, %v43_v12  ;;  %v51_v15 = vmul.f32 0.125, %v49_v13 }
  0x28   :  { %v52_v16 = vsub.f32 %v36_v0, %v50_v14  ;;  %v53_v17 = vsub.f32 %v37_v1, %v51_v15 }
  0x2a   :  { %v54_v18 = vmul.f32 %v52_v16, %v52_v16  ;;  %v55_v19 = vmul.f32 %v53_v17, %v53_v17 }
  0x2c   :  { %v56_v20 = vrot.slane %v54_v18, 4  ;;  %v62_v21 = vrot.slane %v55_v19, 4 }
  0x2e   :  { %v57_v22 = vadd.f32 %v56_v20, %v54_v18  ;;  %v63_v23 = vadd.f32 %v62_v21, %v55_v19 }
  0x30   :  { %v58_v24 = vrot.slane %v57_v22, 2  ;;  %v64_v25 = vrot.slane %v63_v23, 2 }
  0x32   :  { %v59_v26 = vadd.f32 %v58_v24, %v57_v22  ;;  %v65_v27 = vadd.f32 %v64_v25, %v63_v23 }
  0x34   :  { %v60_v28 = vrot.slane %v59_v26, 1  ;;  %v66_v29 = vrot.slane %v65_v27, 1 }
  0x36   :  { %v61_v30 = vadd.f32 %v60_v28, %v59_v26  ;;  %v67_v31 = vadd.f32 %v66_v29, %v65_v27 }
  0x38   :  { %v68_v32 = vmul.f32 0.125, %v61_v30  ;;  %v69_v33 = vmul.f32 0.125, %v67_v31 }
  0x3a   :  { %v71_v34 = vadd.f32 1e-05, %v68_v32  ;;  %v72_v35 = vadd.f32 1e-05, %v69_v33 }
  0x3c   :  { %129 = vrsqrt.f32 %v71_v34 }
  0x3d   :  { %131 = vrsqrt.f32 %v72_v35 }
  0x49   :  { %v130_v41 = vpop.eup %129 }
  0x4a   :  { %v132_v43 = vpop.eup %131 }
  0x4b   :  { %v77_v44 = vcombine.low %v130_v41, %v132_v43 }
  0x4d   :  { %v84_v45 = vrot.slane %v77_v44, %v83_v42 }
  0x4f   :  { %v91_v47 = vrot.slane %v84_v45, %v83_v42 }
  0x51   :  { %v93_v50 = vmul.f32 %v91_v47, %v70_v46 }
  0x53   :  { %v98_v51 = vrot.slane %v93_v50, %v97_v48  ;;  %v102_v52 = vrot.slane %v93_v50, %v101_v49 }
  0x55   :  { %v105_v53 = vmul.f32 %v98_v51, %v52_v16  ;;  %v106_v54 = vmul.f32 %v102_v52, %v53_v17 }
  0x57   :  { %107 = vst [vmem:[#allocation7] sm:$0xff] %v105_v53  ;;  %108 = vst [vmem:[#allocation7 + $0x8] sm:$0xff] %v106_v54 }
  0x58   :  { %184 = shalt.err (!%p181_p0)
}
  0x59   :  { %118 = dma.vmem_to_hbm [thread:$0]  %s116_s1, 256, %s229_s2, [#allocation4]  }
  0x5a   :  { %197 = dma.done.wait [#allocation4], 256  }
  0x5b   :  { %198 = vsyncadd [#allocation4], 4294967040 }
  0x5c   :  { %122 = vsyncpa [#allocation3], 1 }
  0x5d   :  { %123 = vsyncpa [#allocation6], 1 }
  0x5e   :  { %124 = vsyncpa [#allocation4], 1 }

</bundles_post_ra>
